<compile_context>
chip_gen: v7x
topology: tpu7x:2x2x1
jax: 0.10.0
libtpu: 0.0.40
codegen_flags: <defaults>
</compile_context>

<pallas_src>
import jax
import jax.numpy as jnp
from jax.experimental import pallas as pl
from jax.experimental.pallas import tpu as pltpu


def mlp_kernel(x_ref, wc_ref, bc_ref, o_ref):
    # x_ref:  [TB, D]   (D = 89; full last-dim block, unpadded)
    # wc_ref: [D, C]    collapsed weight  Wc = W1 @ W2
    # bc_ref: [1, C]    collapsed bias    bc = b1 @ W2 + b2
    # o_ref:  [TB, C]
    logits = (
        jnp.dot(x_ref[...], wc_ref[...], preferred_element_type=jnp.float32)
        + bc_ref[...]
    )

    # softmax over dim=1 (class axis), numerically stable; reciprocal on EUP.
    m = jnp.max(logits, axis=-1, keepdims=True)
    e = jnp.exp(logits - m)
    probs = e * pl.reciprocal(jnp.sum(e, axis=-1, keepdims=True), approx=True)

    # final elementwise sigmoid: exact divide (only one approx op in the chain).
    o_ref[...] = (1.0 / (1.0 + jnp.exp(-probs))).astype(o_ref.dtype)


def mlp_forward(x, w1, b1, w2, b2, *, batch_tile=1024):
    """x: [B, D] f32; w1: [D, H]; b1: [1, H]; w2: [H, C]; b2: [1, C]."""
    B, D = x.shape
    C = w2.shape[1]

    # Algebraic collapse: hidden_layers is empty (hidden_units=[128]) so there
    # is no ReLU between the two Linear layers and
    #   (x @ W1 + b1) @ W2 + b2 == x @ (W1 @ W2) + (b1 @ W2 + b2)
    # exactly (up to f32 rounding).  Done once, outside the kernel.
    wc = jnp.dot(w1, w2, preferred_element_type=jnp.float32)        # [D, C]
    bc = jnp.dot(b1, w2, preferred_element_type=jnp.float32) + b2   # [1, C]

    cost = pl.CostEstimate(
        flops=int(2 * B * D * C + 2 * B * C),
        transcendentals=int(2 * B * C),                 # softmax exp + sigmoid exp
        bytes_accessed=int(4 * (B * D + D * C + C + B * C)),
    )

    if B <= batch_tile:
        # Small batch: gridless call, everything resident in VMEM — no
        # 1-point-grid pipelining prologue/epilogue, no double buffers,
        # no extra XLA pad/slice ops around the kernel.
        return pl.pallas_call(
            mlp_kernel,
            out_shape=jax.ShapeDtypeStruct((B, C), jnp.float32),
            in_specs=[pl.BlockSpec(memory_space=pltpu.MemorySpace.VMEM)] * 3,
            out_specs=pl.BlockSpec(memory_space=pltpu.MemorySpace.VMEM),
            cost_estimate=cost,
        )(x, wc, bc)

    # Large batch: tile only the batch axis, mark it "parallel" so v7x's two
    # TensorCores both get work (no-op on single-TC v5e/v6e).  x is streamed
    # unpadded; the last block may be ragged — Pallas masks the out-of-bounds
    # rows on writeback and the garbage rows cannot affect valid rows (each
    # row is independent).  Weights/bias are grid-invariant (index_map (0,0))
    # so they stay resident across all grid steps.
    TB = batch_tile
    grid = (pl.cdiv(B, TB),)
    return pl.pallas_call(
        mlp_kernel,
        out_shape=jax.ShapeDtypeStruct((B, C), jnp.float32),
        grid=grid,
        in_specs=[
            pl.BlockSpec((TB, D), lambda i: (i, 0)),   # D=89 == full dim: legal
            pl.BlockSpec((D, C), lambda i: (0, 0)),
            pl.BlockSpec((1, C), lambda i: (0, 0)),
        ],
        out_specs=pl.BlockSpec((TB, C), lambda i: (i, 0)),
        compiler_params=pltpu.CompilerParams(
            dimension_semantics=("parallel",),
        ),
        cost_estimate=cost,
    )(x, wc, bc)
    # If profiling ever shows the x DMA exposed, add
    # pipeline_mode=pl.Buffered(3) on the x BlockSpec only.


if __name__ == "__main__":
    # MlpModel(input_dim=89, hidden_units=[128], num_classes=10)
    B, D, H, C = 8, 89, 128, 10

    key = jax.random.PRNGKey(0)
    kx, kw1, kb1, kw2, kb2 = jax.random.split(key, 5)

    x = jax.random.normal(kx, (B, D), dtype=jnp.float32)

    # Deterministic synthetic parameters (PyTorch-like uniform init ranges),
    # stored as [in_features, out_features].
    lim1 = 1.0 / jnp.sqrt(jnp.float32(D))
    w1 = jax.random.uniform(kw1, (D, H), jnp.float32, -lim1, lim1)
    b1 = jax.random.uniform(kb1, (1, H), jnp.float32, -lim1, lim1)
    lim2 = 1.0 / jnp.sqrt(jnp.float32(H))
    w2 = jax.random.uniform(kw2, (H, C), jnp.float32, -lim2, lim2)
    b2 = jax.random.uniform(kb2, (1, C), jnp.float32, -lim2, lim2)

    # Pure-JAX reference (un-collapsed, matches the PyTorch forward exactly).
    def ref_fn(xr):
        logits = (xr @ w1 + b1) @ w2 + b2
        return jax.nn.sigmoid(jax.nn.softmax(logits, axis=1))

    # --- small-batch (gridless) path ---
    out = mlp_forward(x, w1, b1, w2, b2)
    out = jax.block_until_ready(out)
    assert out.shape == (B, C)
    # approx softmax reciprocal + collapsed-matmul rounding -> relaxed tol.
    assert jnp.allclose(out, ref_fn(x), atol=2e-3, rtol=2e-3)

    # --- batch-tiled ("parallel" grid) path, with a ragged last tile ---
    B2 = 2500
    x2 = jax.random.normal(jax.random.PRNGKey(1), (B2, D), dtype=jnp.float32)
    out2 = mlp_forward(x2, w1, b1, w2, b2, batch_tile=1024)
    out2 = jax.block_until_ready(out2)
    assert out2.shape == (B2, C)
    assert jnp.allclose(out2, ref_fn(x2), atol=2e-3, rtol=2e-3)

    print("KERNEL_OK")
</pallas_src>

<mosaic_0001>
module attributes {stable_mosaic.version = 11 : i64} {
  func.func @mlp_kernel(%arg0: memref<8x89xf32, #tpu.memory_space<vmem>>, %arg1: memref<89x10xf32, #tpu.memory_space<vmem>>, %arg2: memref<1x10xf32, #tpu.memory_space<vmem>>, %arg3: memref<8x10xf32, #tpu.memory_space<vmem>>) attributes {dimension_semantics = [], scalar_prefetch = 0 : i64, scratch_operands = 0 : i64, tpu.core_type = #tpu.core_type<tc>} {
    %c0 = arith.constant 0 : index
    %c0_0 = arith.constant 0 : index
    %0 = vector.load %arg0[%c0, %c0_0] : memref<8x89xf32, #tpu.memory_space<vmem>>, vector<8x89xf32>
    %c0_1 = arith.constant 0 : index
    %c0_2 = arith.constant 0 : index
    %1 = vector.load %arg1[%c0_1, %c0_2] : memref<89x10xf32, #tpu.memory_space<vmem>>, vector<89x10xf32>
    %cst = arith.constant dense<0.000000e+00> : vector<8x10xf32>
    %2 = tpu.matmul %0, %1, %cst {dimension_numbers = #tpu.dot_dimension_numbers<[1], [0], [0], [1], [0, 0, 1, 1], [], []>} : vector<8x89xf32>, vector<89x10xf32>, vector<8x10xf32> -> vector<8x10xf32>
    %c0_3 = arith.constant 0 : index
    %c0_4 = arith.constant 0 : index
    %3 = vector.load %arg2[%c0_3, %c0_4] : memref<1x10xf32, #tpu.memory_space<vmem>>, vector<1x10xf32>
    %4 = vector.broadcast %3 : vector<1x10xf32> to vector<8x10xf32>
    %5 = arith.addf %2, %4 : vector<8x10xf32>
    %cst_5 = arith.constant dense<0xFF800000> : vector<8xf32>
    %6 = vector.multi_reduction <maximumf>, %5, %cst_5 [1] : vector<8x10xf32> to vector<8xf32>
    %7 = vector.shape_cast %6 : vector<8xf32> to vector<8x1xf32>
    %8 = vector.broadcast %7 : vector<8x1xf32> to vector<8x10xf32>
    %9 = arith.subf %5, %8 : vector<8x10xf32>
    %10 = math.exp %9 : vector<8x10xf32>
    %cst_6 = arith.constant dense<0.000000e+00> : vector<8xf32>
    %11 = vector.multi_reduction <add>, %10, %cst_6 [1] : vector<8x10xf32> to vector<8xf32>
    %12 = vector.shape_cast %11 : vector<8xf32> to vector<8x1xf32>
    %13 = tpu.reciprocal %12 {approx = true} : vector<8x1xf32> -> vector<8x1xf32>
    %14 = vector.broadcast %13 : vector<8x1xf32> to vector<8x10xf32>
    %15 = arith.mulf %10, %14 : vector<8x10xf32>
    %cst_7 = arith.constant 0.000000e+00 : f32
    %16 = vector.broadcast %cst_7 : f32 to vector<8x10xf32>
    %17 = arith.subf %16, %15 : vector<8x10xf32>
    %18 = math.exp %17 : vector<8x10xf32>
    %cst_8 = arith.constant 1.000000e+00 : f32
    %19 = vector.broadcast %cst_8 : f32 to vector<8x10xf32>
    %20 = arith.addf %19, %18 : vector<8x10xf32>
    %cst_9 = arith.constant 1.000000e+00 : f32
    %21 = vector.broadcast %cst_9 : f32 to vector<8x10xf32>
    %22 = arith.divf %21, %20 : vector<8x10xf32>
    %c0_10 = arith.constant 0 : index
    %c0_11 = arith.constant 0 : index
    %23 = vector.load %arg3[%c0_10, %c0_11] : memref<8x10xf32, #tpu.memory_space<vmem>>, vector<8x10xf32>
    tpu.vector_store %arg3[%c0_10, %c0_11], %22 {strides = array<i32>} : memref<8x10xf32, #tpu.memory_space<vmem>>, vector<8x10xf32>,
    return
  }
}

</mosaic_0001>

<bundles_post_ra>
// kernel: tpu_custom_call.1
= control target key start
LH: loop header
LB: loop body
LE: loop exit
PB: predicated region body
PF: predicated region fallthrough
CT: control target
= control target key end

     0   :  { %v245_v3 = vmov 0.0|0.0   ;;  %vm246_vm0 = vmmov 0   ;;  %v247_v6 = vmov 0.0   ;;  %s327_s0 = inlined_call_operand.vmem [shape: f32[8,89], index: 0, kind: input, shape index: {}]   ;;  %s328_s1 = inlined_call_operand.vmem [shape: f32[89,10], index: 1, kind: input, shape index: {}]   ;;  %s329_s2 = inlined_call_operand.vmem [shape: f32[1,10], index: 2, kind: input, shape index: {}]   ;;  %s330_s3 = inlined_call_operand.hbm [shape: f32[8,10], index: 3, kind: output, shape index: {}]  }
   0x1   :  { %v16_v0 = vld [vmem:[%s328_s1] sm:$0xff]  ;;  %v17_v1 = vld [vmem:[%s328_s1 + $0x8] sm:$0xff]  ;;  %v18_v2 = vld [vmem:[%s328_s1 + $0x10] sm:$0xff]  ;;  %189 = vmatprep.subr.bf16.mxu0 %v245_v3  ;;  %186 = vmatprep.mubr.msk.f32.mxu0 %vm246_vm0, %v247_v6 }
   0x2   :  { %v190_v4 = vpack.c.bf16 %v17_v1, %v16_v0  ;;  %v19_v5 = vld [vmem:[%s328_s1 + $0x18] sm:$0xff]  ;;  %v20_v8 = vld [vmem:[%s328_s1 + $0x20] sm:$0xff]  ;;  %v21_v9 = vld [vmem:[%s328_s1 + $0x28] sm:$0xff] }
   0x3   :  { %v193_v7 = vpack.c.bf16 %v19_v5, %v18_v2 }
   0x4   :  { %191 = vmatpush3.bf16.msra.mxu0 %v190_v4 }
   0x5   :  { %192 = vmatprep.subr.bf16.mxu0 %v245_v3 }
   0x6   :  { %8 = vsyncpa [#allocation3], 0  ;;  %v196_v10 = vpack.c.bf16 %v21_v9, %v20_v8  ;;  %v22_v11 = vld [vmem:[%s328_s1 + $0x30] sm:$0xff]  ;;  %v23_v12 = vld [vmem:[%s328_s1 + $0x38] sm:$0xff]  ;;  %vm39_vm1 = vcmask 1040384   ;;  %vm248_vm2 = vmmov 1  }
   0x7   :  { %v199_v13 = vpack.c.bf16 %v23_v12, %v22_v11  ;;  %v24_v14 = vld [vmem:[%s328_s1 + $0x40] sm:$0xff]  ;;  %v25_v15 = vld [vmem:[%s328_s1 + $0x48] sm:$0xff]  ;;  %v26_v17 = vld [vmem:[%s328_s1 + $0x50] sm:$0xff]  ;;  %vm35_vm4 = vcmask 728064   ;;  %vm113_vm5 = vcmask 80896  }
   0x8   :  { %194 = vmatpush3.bf16.msra.mxu0 %v193_v7  ;;  %v202_v16 = vpack.c.bf16 %v25_v15, %v24_v14  ;;  %v27_v18 = vld [vmem:[%s328_s1 + $0x58] sm:$0x1]  ;;  %vm206_vm3 = vmpackc.low %vm39_vm1, %vm248_vm2  ;;  %v15_v20 = vld [vmem:[%s327_s0] sm:$0xff]  ;;  %s249_s0 = smov [#allocation2]  }
   0x9   :  { %195 = vmatprep.subr.bf16.mxu0 %v245_v3  ;;  %v205_v19 = vpack.c.bf16 %v27_v18, %v26_v17  ;;  %v146_v21 = vld [vmem:[%s329_s2] ss:$0 sm:$0xff]  ;;  %s138_s1 = sshll.u32 %s249_s0, 4  ;;  %s139_s1 = int_to_ptr.vmem [resolvable:$true] %s138_s1 }
   0xa   :  { %s221_s2 = scalar_lea.vmem %s139_s1, 128  ;;  %p226_p1 = scmp.lt.s32.totalorder %s139_s1, %s139_s1 }
   0xb   :  { %p222_p0 = scmp.ne.s32.totalorder %s139_s1, %s221_s2  ;;  %p227_p2 = scmp.lt.s32.totalorder %s221_s2, %s221_s2 }
   0xc   :  { %197 = vmatpush3.bf16.msra.mxu0 %v196_v10 }
   0xd   :  { %198 = vmatprep.subr.bf16.mxu0 %v245_v3  ;;  %p228_p3 = por %p227_p2, %p226_p1 }
   0xf   :  { %p229_p4 = pnand %p228_p3, %p222_p0 }
  0x10   :  { %200 = vmatpush3.bf16.msra.mxu0 %v199_v13 }
  0x11   :  { %201 = vmatprep.subr.bf16.mxu0 %v245_v3 }
  0x14   :  { %203 = vmatpush3.bf16.msra.mxu0 %v202_v16 }
  0x15   :  { %204 = vmatprep.subr.bf16.mxu0 %v245_v3 }
  0x18   :  { %207 = vmatpush3.bf16.msk.msra.mxu0 %vm206_vm3, %v205_v19 }
  0x1b   :  { %187 = vmatmul.mubr.msk.f32.vlgmr.msra.gmra.mrb[0].mxu0 %vm35_vm4, %v15_v20 }
  0xee   :  { %v109_v22 = vpop.f32.mrb[0].mxu0 }
  0xef   :  { %v110_v23 = vadd.f32 %v146_v21, %v109_v22  ;;  %v188_v24 = vpop.f32.mrb[1].mxu0 }
  0xf1   :  { %v114_v25 = vsel %vm113_vm5, %v110_v23, -inf }
  0xf2   :  { %115 = vmax.xlane.f32.xlu0 %v114_v25 }
 0x17f   :  { %v116_v26 = vpop.xlane.xlu0 %115 }
 0x180   :  { %v117_v27 = vsub.f32 %v110_v23, %v116_v26 }
 0x182   :  { %v118_v28 = vmul.f32 1.442695, %v117_v27 }
 0x184   :  { %213 = vpow2.f32 %v118_v28 }
 0x18e   :  { %v214_v29 = vpop.eup %213 }
 0x18f   :  { %v120_v30 = vsel %vm113_vm5, %v214_v29, 0.0 }
 0x190   :  { %121 = vadd.xlane.f32.xlu0 %v120_v30 }
 0x21d   :  { %v122_v31 = vpop.xlane.xlu0 %121 }
 0x21e   :  { %215 = vrcp.f32 %v122_v31 }
 0x228   :  { %v216_v32 = vpop.eup %215 }
 0x229   :  { %v124_v33 = vmul.f32 %v216_v32, %v214_v29 }
 0x22b   :  { %v125_v34 = vsub.f32 0.0, %v124_v33 }
 0x22d   :  { %v126_v35 = vmul.f32 1.442695, %v125_v34 }
 0x22f   :  { %217 = vpow2.f32 %v126_v35 }
 0x239   :  { %v218_v36 = vpop.eup %217 }
 0x23a   :  { %v128_v37 = vadd.f32 1.0, %v218_v36 }
 0x23c   :  { %219 = vrcp.f32 %v128_v37 }
 0x246   :  { %v220_v38 = vpop.eup %219 }
 0x247   :  { %131 = vst.msk [vmem:[#allocation2] sm:$0xff] %vm113_vm5, %v220_v38 }
 0x248   :  { %232 = shalt.err (!%p229_p4)
}
 0x249   :  { %s233_s15 = scalar_lea.hbm %s330_s3, 128 }
 0x24a   :  { %p234_p5 = scmp.ne.s32.totalorder %s330_s3, %s233_s15  ;;  %p237_p6 = scmp.lt.u32.totalorder %s233_s15, %s330_s3 }
 0x24c   :  { %p239_p7 = pnand %p237_p6, %p234_p5 }
 0x24e   :  { %242 = shalt.err (!%p239_p7)
}
 0x24f   :  { %141 = dma.vmem_to_hbm [thread:$0]  %s139_s1, 128, %s330_s3, [#allocation3]  }
 0x250   :  { %243 = dma.done.wait [#allocation3], 128  }
 0x251   :  { %244 = vsyncadd [#allocation3], 4294967168 }
 0x252   :  { %145 = vsyncpa [#allocation3], 1 }

</bundles_post_ra>
